<compile_context>
chip_gen: v7x
topology: tpu7x:2x2x1
jax: 0.10.0
libtpu: 0.0.40
codegen_flags: <defaults>
</compile_context>

<pallas_src>
import math
import functools

import jax
import jax.numpy as jnp
from jax.experimental import pallas as pl
from jax.experimental.pallas import tpu as pltpu


def _am_softmax_kernel(cos_ref, cos_tgt_ref, phi_t_ref, extra_ref, out_ref,
                       esum_ref, *, s, t, gamma, shift):
    """Streams class tiles, accumulating a constant-shift exp-sum per row.

    Hot loop per element: 2 VALU (mul, sub) [+3 VALU for t > 1] + 1 EUP exp
    + ~1 VALU lane-group add.  All margin / one-hot work happens in the
    finalize on (tile_b, 1) rows.
    """
    ci = pl.program_id(1)
    n_ct = pl.num_programs(1)

    cos = cos_ref[...].astype(jnp.float32)            # (TB, TC)
    tb, tc = cos.shape

    if t > 1.0:
        phi_t_row = phi_t_ref[...]                    # (TB, 1) f32
        h_theta = (t - 1.0) + t * cos
        out_val = jnp.where(cos > phi_t_row, h_theta, cos)
    else:
        out_val = cos

    # Every exponent is <= 0 by construction of `shift`, so no row max needed.
    eterm = jnp.exp(s * out_val - shift)              # (TB, TC)

    # Lane-structured partial reduce: (TB, TC) -> (TB, LANES) using only
    # lane-aligned VALU adds; the cross-lane 128->1 reduce is deferred to the
    # finalize (one XLU reduce per batch tile instead of one per class tile).
    lanes = esum_ref.shape[1]                         # min(tile_c, 128)
    part = eterm[:, :lanes]
    for grp in range(1, tc // lanes):
        part = part + eterm[:, grp * lanes:(grp + 1) * lanes]

    @pl.when(ci == 0)
    def _init():
        esum_ref[...] = jnp.zeros_like(esum_ref)

    esum_ref[...] += part

    @pl.when(ci == n_ct - 1)
    def _finalize():
        cos_t = cos_tgt_ref[...]                      # (TB, 1) f32
        phi_t = phi_t_ref[...]                        # (TB, 1) f32

        # The streamed (uncorrected) value of the target column uses exactly
        # the same formula as the hot loop, so subtracting it cancels the
        # target column's contribution; then add the true term exp(s*phi_t-shift).
        if t > 1.0:
            h_t = (t - 1.0) + t * cos_t
            streamed_t = jnp.where(cos_t > phi_t, h_t, cos_t)
        else:
            streamed_t = cos_t
        wrong_term = jnp.exp(s * streamed_t - shift)
        right_term = jnp.exp(s * phi_t - shift)

        total = jnp.sum(esum_ref[...], axis=1, keepdims=True)       # (TB, 1)
        total = total + extra_ref[...] - wrong_term + right_term

        ce = jnp.log(total) + shift - s * phi_t                      # (TB, 1)

        if (gamma > 0.0) and (t == 1.0):
            one_minus_p = 1.0 - jnp.exp(-ce)
            gf = float(gamma)
            if gf.is_integer() and 1.0 <= gf <= 8.0:
                w = one_minus_p
                for _ in range(int(gf) - 1):
                    w = w * one_minus_p
            else:
                w = one_minus_p ** gf
            per = w * ce
        else:
            per = ce
        out_ref[...] = per.astype(out_ref.dtype)


def _vmem_budget():
    """(is_big_vmem_generation, vmem_limit_bytes) — v5e/v6e vs v7x sizing."""
    vmem_bytes = 64 * 1024 * 1024
    try:
        info = pltpu.get_tpu_info()
        vmem_bytes = int(getattr(info, "vmem_capacity_bytes", vmem_bytes))
    except Exception:
        pass
    big = vmem_bytes >= 100 * 1024 * 1024          # v5e / v6e: 128 MiB VMEM
    vmem_limit = (64 << 20) if big else (40 << 20)  # v7x: 64 MiB physical
    return big, vmem_limit


def _pick_tiles(B, C, itemsize, big_vmem):
    """Lane-dense, dtype-aware class tile; sublane-aligned batch tile."""
    # Class (lane) tile: multiple of 128, dtype-aware, capped so the unrolled
    # lane-group adds and VMEM temporaries stay reasonable.
    if C <= 128:
        tile_c = C
    else:
        if big_vmem:
            cap_c = 8192 if itemsize <= 2 else 4096
        else:
            cap_c = 4096 if itemsize <= 2 else 2048
        tile_c = min((C // 128) * 128, cap_c)

    if B <= 8:
        return B, tile_c

    # Batch (sublane) tile: fill the per-tile element budget (input buffer is
    # double-buffered and ~3 f32 tile-sized temporaries live alongside it),
    # keep >= 2 batch tiles so both v7x TensorCores / megacore get work, and
    # prefer a divisor of B so padded garbage rows never exist.
    target_elems = (3 << 19) if big_vmem else (3 << 18)   # 1.5M / 0.75M elems
    tb = max(8, (target_elems // max(1, tile_c)) // 8 * 8)
    tb = min(tb, 512)
    tb = min(tb, (B // 8) * 8)
    tb = min(tb, max(8, (B // 2 // 8) * 8))               # >= 2 batch tiles
    tile_b = tb
    for cand in range(tb, max(7, tb // 2 - 1), -8):       # divisor of B nearby
        if B % cand == 0:
            tile_b = cand
            break
    return tile_b, tile_c


def am_softmax_loss(cos_theta, target, *, margin_type='cos', gamma=0.0,
                    m=0.5, s=30.0, t=1.0, tile_b=None, tile_c=None):
    """Pallas-backed AMSoftmaxLoss forward.

    cos_theta: [B, C] float (f32 or bf16), target: [B] int. Returns scalar loss.
    """
    assert margin_type in ('cos', 'arc')
    assert gamma >= 0 and m > 0 and s > 0 and t >= 1
    B, C = cos_theta.shape
    m, s, t, gamma = float(m), float(s), float(t), float(gamma)

    # logits <= s * ub, so every streamed term exp(s*out - shift) <= 1.
    ub = max(1.0, 2.0 * t - 1.0)
    shift = s * ub
    # Guard: the guaranteed-surviving target term exp(s*phi_t - shift) must not
    # underflow to 0 in f32 (phi_t >= -1 - m for both margin types).
    assert s * (1.0 + m + ub) < 100.0, (
        "am_softmax_loss: scale s too large for constant-shift logsumexp; "
        "a running-max formulation is required for this configuration")

    cos_m_, sin_m_, th_ = math.cos(m), math.sin(m), math.cos(math.pi - m)

    # Tiny (B,1) wrapper-side prep: target-class cosine gather and its margin.
    tgt = target.astype(jnp.int32).reshape(B, 1)
    cos_tgt = jnp.take_along_axis(cos_theta, tgt, axis=1).astype(jnp.float32)
    if margin_type == 'cos':
        phi_t = cos_tgt - m
    else:
        sine_t = jnp.sqrt(jnp.maximum(1.0 - cos_tgt * cos_tgt, 0.0))
        phi_t = jnp.where(cos_tgt > th_, cos_tgt * cos_m_ - sine_t * sin_m_,
                          cos_tgt - sin_m_ * m)

    itemsize = jnp.dtype(cos_theta.dtype).itemsize
    big_vmem, vmem_limit = _vmem_budget()
    auto_tb, auto_tc = _pick_tiles(B, C, itemsize, big_vmem)
    if tile_b is None:
        tile_b = auto_tb
    if tile_c is None:
        tile_c = auto_tc
    tile_b = min(tile_b, B)
    tile_c = min(tile_c, C)
    if tile_b != B:
        assert tile_b % 8 == 0, "batch tile must be a multiple of 8 sublanes"
    if tile_c != C:
        assert tile_c % 128 == 0, "class tile must be a multiple of 128 lanes"

    n_bt = pl.cdiv(B, tile_b)
    n_ct = max(1, C // tile_c)
    c_main = n_ct * tile_c

    # Remainder classes (C % tile_c) are folded in here so the kernel's hot
    # loop never needs a partial-tile mask.
    if c_main < C:
        cos_rem = cos_theta[:, c_main:].astype(jnp.float32)
        if t > 1.0:
            out_rem = jnp.where(cos_rem > phi_t, (t - 1.0) + t * cos_rem,
                                cos_rem)
        else:
            out_rem = cos_rem
        extra = jnp.sum(jnp.exp(s * out_rem - shift), axis=1, keepdims=True)
    else:
        extra = jnp.zeros((B, 1), jnp.float32)

    kernel = functools.partial(_am_softmax_kernel, s=s, t=t, gamma=gamma,
                               shift=shift)

    lanes = min(tile_c, 128)
    flops_per = 3 if t == 1.0 else 7
    cost = pl.CostEstimate(
        flops=flops_per * B * c_main,
        transcendentals=B * c_main,                 # one exp per element
        bytes_accessed=B * c_main * itemsize + 4 * B * 4)

    per_sample = pl.pallas_call(
        kernel,
        out_shape=jax.ShapeDtypeStruct((B, 1), jnp.float32),
        grid_spec=pltpu.PrefetchScalarGridSpec(
            num_scalar_prefetch=0,
            grid=(n_bt, n_ct),
            in_specs=[
                pl.BlockSpec((tile_b, tile_c), lambda bi, ci: (bi, ci)),
                pl.BlockSpec((tile_b, 1), lambda bi, ci: (bi, 0)),
                pl.BlockSpec((tile_b, 1), lambda bi, ci: (bi, 0)),
                pl.BlockSpec((tile_b, 1), lambda bi, ci: (bi, 0)),
            ],
            out_specs=pl.BlockSpec((tile_b, 1), lambda bi, ci: (bi, 0)),
            scratch_shapes=[pltpu.VMEM((tile_b, lanes), jnp.float32)],
        ),
        compiler_params=pltpu.CompilerParams(
            dimension_semantics=("parallel", "arbitrary"),
            vmem_limit_bytes=vmem_limit),
        cost_estimate=cost,
    )(cos_theta, cos_tgt, phi_t, extra)

    # tiny mean over B in the wrapper keeps the batch grid axis parallel
    return jnp.sum(per_sample) / B


def _reference(cos_theta, target, *, margin_type='cos',
               gamma=0.0, m=0.5, s=30.0, t=1.0):
    """Pure-JAX reference mirroring the PyTorch module, for silent validation."""
    cos_m, sin_m, th = math.cos(m), math.sin(m), math.cos(math.pi - m)
    cos = cos_theta.astype(jnp.float32)
    B, C = cos.shape
    index = jax.nn.one_hot(target, C, dtype=jnp.bool_)
    if margin_type == 'cos':
        phi = cos - m
    else:
        sine = jnp.sqrt(jnp.maximum(1.0 - cos ** 2, 0.0))
        phi = jnp.where(cos > th, cos * cos_m - sine * sin_m, cos - sin_m * m)
    output = jnp.where(index, phi, cos)
    if t > 1.0:
        h = t - 1.0 + t * cos
        phi_t = jnp.sum(jnp.where(index, phi, 0.0), axis=1, keepdims=True)
        sv = jnp.logical_and(~index, (phi_t - cos) < 0.0)
        output = jnp.where(sv, h, output)
    logits = s * output
    ce = jax.nn.logsumexp(logits, axis=1) - jnp.take_along_axis(
        logits, target[:, None], axis=1)[:, 0]
    if (gamma == 0.0 and t == 1.0) or t > 1.0:
        return jnp.mean(ce)
    p = jnp.exp(-ce)
    return jnp.mean((1.0 - p) ** gamma * ce)


if __name__ == "__main__":
    key = jax.random.PRNGKey(0)
    k1, k2 = jax.random.split(key)

    # small, but enough to exercise a 2x2 grid plus a wrapper-handled
    # class-remainder (320 = 2*128 + 64) and targets that fall inside it
    B, C = 16, 320
    cos_theta = jnp.tanh(jax.random.normal(k1, (B, C), dtype=jnp.float32))
    target = jax.random.randint(k2, (B,), 0, C, dtype=jnp.int32)

    configs = [
        dict(margin_type='cos', gamma=0.0, m=0.5, s=30.0, t=1.0),   # plain CE
        dict(margin_type='arc', gamma=2.0, m=0.5, s=30.0, t=1.0),   # arc+focal
        dict(margin_type='cos', gamma=0.0, m=0.5, s=30.0, t=1.2),   # t > 1
        dict(margin_type='arc', gamma=0.0, m=0.3, s=30.0, t=1.1),   # arc, t > 1
    ]
    for cfg in configs:
        # explicit small tiles: grid=(2, 2) with a 64-class wrapper remainder
        loss = am_softmax_loss(cos_theta, target, tile_b=8, tile_c=128, **cfg)
        jax.block_until_ready(loss)
        ref = _reference(cos_theta, target, **cfg)
        assert jnp.allclose(loss, ref, rtol=1e-5, atol=1e-5), (cfg, loss, ref)

    # auto tile selection path
    loss_auto = am_softmax_loss(cos_theta, target)
    jax.block_until_ready(loss_auto)
    ref_auto = _reference(cos_theta, target)
    assert jnp.allclose(loss_auto, ref_auto, rtol=1e-5, atol=1e-5)

    # bf16 input path (halved HBM traffic at scale; compute still f32)
    loss_bf16 = am_softmax_loss(cos_theta.astype(jnp.bfloat16), target)
    jax.block_until_ready(loss_bf16)
    ref_bf16 = _reference(cos_theta.astype(jnp.bfloat16), target)
    assert jnp.allclose(loss_bf16, ref_bf16, rtol=1e-4, atol=1e-4)

    print("KERNEL_OK")
</pallas_src>

<mosaic_0001>
module attributes {stable_mosaic.version = 11 : i64} {
  func.func @_am_softmax_kernel(%arg0: i32, %arg1: i32, %arg2: memref<8x128xf32, #tpu.memory_space<vmem>>, %arg3: memref<8x1xf32, #tpu.memory_space<vmem>>, %arg4: memref<8x1xf32, #tpu.memory_space<vmem>>, %arg5: memref<8x1xf32, #tpu.memory_space<vmem>>, %arg6: memref<8x1xf32, #tpu.memory_space<vmem>>, %arg7: memref<8x128xf32, #tpu.memory_space<vmem>>) attributes {dimension_semantics = [#tpu.dimension_semantics<parallel>, #tpu.dimension_semantics<arbitrary>], iteration_bounds = array<i64: 2, 2>, scalar_prefetch = 0 : i64, scratch_operands = 1 : i64, tpu.core_type = #tpu.core_type<tc>, window_params = [{transform_indices = @transform_0, window_bounds = array<i64: 8, 128>}, {transform_indices = @transform_1, window_bounds = array<i64: 8, 1>}, {transform_indices = @transform_2, window_bounds = array<i64: 8, 1>}, {transform_indices = @transform_3, window_bounds = array<i64: 8, 1>}, {transform_indices = @transform_4, window_bounds = array<i64: 8, 1>}]} {
    %c0 = arith.constant 0 : index
    %c0_0 = arith.constant 0 : index
    %0 = vector.load %arg2[%c0, %c0_0] : memref<8x128xf32, #tpu.memory_space<vmem>>, vector<8x128xf32>
    %cst = arith.constant 3.000000e+01 : f32
    %1 = vector.broadcast %cst : f32 to vector<8x128xf32>
    %2 = arith.mulf %1, %0 : vector<8x128xf32>
    %cst_1 = arith.constant 3.000000e+01 : f32
    %3 = vector.broadcast %cst_1 : f32 to vector<8x128xf32>
    %4 = arith.subf %2, %3 : vector<8x128xf32>
    %5 = math.exp %4 : vector<8x128xf32>
    %c0_i32 = arith.constant 0 : i32
    %6 = arith.cmpi eq, %arg1, %c0_i32 : i32
    %7 = arith.extui %6 : i1 to i32
    %c0_i32_2 = arith.constant 0 : i32
    %8 = arith.cmpi ne, %7, %c0_i32_2 : i32
    scf.if %8 {
      %cst_8 = arith.constant 0.000000e+00 : f32
      %15 = vector.broadcast %cst_8 : f32 to vector<8x128xf32>
      %c0_9 = arith.constant 0 : index
      %c0_10 = arith.constant 0 : index
      %16 = vector.load %arg7[%c0_9, %c0_10] : memref<8x128xf32, #tpu.memory_space<vmem>>, vector<8x128xf32>
      tpu.vector_store %arg7[%c0_9, %c0_10], %15 {strides = array<i32>} : memref<8x128xf32, #tpu.memory_space<vmem>>, vector<8x128xf32>,
    } else {
    }
    %c0_3 = arith.constant 0 : index
    %c0_4 = arith.constant 0 : index
    %9 = vector.load %arg7[%c0_3, %c0_4] : memref<8x128xf32, #tpu.memory_space<vmem>>, vector<8x128xf32>
    %10 = arith.addf %9, %5 : vector<8x128xf32>
    %c0_5 = arith.constant 0 : index
    %c0_6 = arith.constant 0 : index
    %11 = vector.load %arg7[%c0_5, %c0_6] : memref<8x128xf32, #tpu.memory_space<vmem>>, vector<8x128xf32>
    tpu.vector_store %arg7[%c0_5, %c0_6], %10 {strides = array<i32>} : memref<8x128xf32, #tpu.memory_space<vmem>>, vector<8x128xf32>,
    %c1_i32 = arith.constant 1 : i32
    %12 = arith.cmpi eq, %arg1, %c1_i32 : i32
    %13 = arith.extui %12 : i1 to i32
    %c0_i32_7 = arith.constant 0 : i32
    %14 = arith.cmpi ne, %13, %c0_i32_7 : i32
    scf.if %14 {
      %c0_8 = arith.constant 0 : index
      %c0_9 = arith.constant 0 : index
      %15 = vector.load %arg3[%c0_8, %c0_9] : memref<8x1xf32, #tpu.memory_space<vmem>>, vector<8x1xf32>
      %c0_10 = arith.constant 0 : index
      %c0_11 = arith.constant 0 : index
      %16 = vector.load %arg4[%c0_10, %c0_11] : memref<8x1xf32, #tpu.memory_space<vmem>>, vector<8x1xf32>
      %cst_12 = arith.constant 3.000000e+01 : f32
      %17 = vector.broadcast %cst_12 : f32 to vector<8x1xf32>
      %18 = arith.mulf %17, %15 : vector<8x1xf32>
      %cst_13 = arith.constant 3.000000e+01 : f32
      %19 = vector.broadcast %cst_13 : f32 to vector<8x1xf32>
      %20 = arith.subf %18, %19 : vector<8x1xf32>
      %21 = math.exp %20 : vector<8x1xf32>
      %cst_14 = arith.constant 3.000000e+01 : f32
      %22 = vector.broadcast %cst_14 : f32 to vector<8x1xf32>
      %23 = arith.mulf %22, %16 : vector<8x1xf32>
      %cst_15 = arith.constant 3.000000e+01 : f32
      %24 = vector.broadcast %cst_15 : f32 to vector<8x1xf32>
      %25 = arith.subf %23, %24 : vector<8x1xf32>
      %26 = math.exp %25 : vector<8x1xf32>
      %c0_16 = arith.constant 0 : index
      %c0_17 = arith.constant 0 : index
      %27 = vector.load %arg7[%c0_16, %c0_17] : memref<8x128xf32, #tpu.memory_space<vmem>>, vector<8x128xf32>
      %cst_18 = arith.constant dense<0.000000e+00> : vector<8xf32>
      %28 = vector.multi_reduction <add>, %27, %cst_18 [1] : vector<8x128xf32> to vector<8xf32>
      %29 = vector.shape_cast %28 : vector<8xf32> to vector<8x1xf32>
      %c0_19 = arith.constant 0 : index
      %c0_20 = arith.constant 0 : index
      %30 = vector.load %arg5[%c0_19, %c0_20] : memref<8x1xf32, #tpu.memory_space<vmem>>, vector<8x1xf32>
      %31 = arith.addf %29, %30 : vector<8x1xf32>
      %32 = arith.subf %31, %21 : vector<8x1xf32>
      %33 = arith.addf %32, %26 : vector<8x1xf32>
      %34 = math.log %33 : vector<8x1xf32>
      %cst_21 = arith.constant 3.000000e+01 : f32
      %35 = vector.broadcast %cst_21 : f32 to vector<8x1xf32>
      %36 = arith.addf %34, %35 : vector<8x1xf32>
      %cst_22 = arith.constant 3.000000e+01 : f32
      %37 = vector.broadcast %cst_22 : f32 to vector<8x1xf32>
      %38 = arith.mulf %37, %16 : vector<8x1xf32>
      %39 = arith.subf %36, %38 : vector<8x1xf32>
      %c0_23 = arith.constant 0 : index
      %c0_24 = arith.constant 0 : index
      %40 = vector.load %arg6[%c0_23, %c0_24] : memref<8x1xf32, #tpu.memory_space<vmem>>, vector<8x1xf32>
      tpu.vector_store %arg6[%c0_23, %c0_24], %39 {strides = array<i32>} : memref<8x1xf32, #tpu.memory_space<vmem>>, vector<8x1xf32>,
    } else {
    }
    return
  }
  func.func @transform_0(%arg0: i32, %arg1: i32) -> (i32, i32) {
    %c0_i32 = arith.constant 0 : i32
    return %arg0, %arg1 : i32, i32
  }
  func.func @transform_1(%arg0: i32, %arg1: i32) -> (i32, i32) {
    %c0_i32 = arith.constant 0 : i32
    %c0_i32_0 = arith.constant 0 : i32
    return %arg0, %c0_i32 : i32, i32
  }
  func.func @transform_2(%arg0: i32, %arg1: i32) -> (i32, i32) {
    %c0_i32 = arith.constant 0 : i32
    %c0_i32_0 = arith.constant 0 : i32
    return %arg0, %c0_i32 : i32, i32
  }
  func.func @transform_3(%arg0: i32, %arg1: i32) -> (i32, i32) {
    %c0_i32 = arith.constant 0 : i32
    %c0_i32_0 = arith.constant 0 : i32
    return %arg0, %c0_i32 : i32, i32
  }
  func.func @transform_4(%arg0: i32, %arg1: i32) -> (i32, i32) {
    %c0_i32 = arith.constant 0 : i32
    %c0_i32_0 = arith.constant 0 : i32
    return %arg0, %c0_i32 : i32, i32
  }
}

</mosaic_0001>

<bundles_post_ra>
// kernel: tpu_custom_call.1
= control target key start
LH: loop header
LB: loop body
LE: loop exit
PB: predicated region body
PF: predicated region fallthrough
CT: control target
= control target key end

     0   :  { %s549_s15 = smov 0   ;;  %s551_s16 = smov 0   ;;  %s631_s0 = inlined_call_operand.vmem [shape: f32[16,320], index: 0, kind: input, shape index: {}]   ;;  %s632_s1 = inlined_call_operand.vmem [shape: f32[16,1], index: 1, kind: input, shape index: {}]   ;;  %s633_s2 = inlined_call_operand.vmem [shape: f32[16,1], index: 2, kind: input, shape index: {}]   ;;  %s634_s3 = inlined_call_operand.vmem [shape: f32[16,1], index: 3, kind: input, shape index: {}]   ;;  %s635_s4 = inlined_call_operand.vmem [shape: f32[16,1], index: 4, kind: output, shape index: {}]  }
   0x1   :  { %s553_s17 = smov 0   ;;  %s555_s18 = smov 0  }
   0x2   :  { %s557_s19 = smov 0  }
   0x3 LB: > { %s23_s20 = sadd.s32 1, %s513_s17  ;;  %s26_s21 = sadd.s32 1, %s517_s18  ;;  %s521_s19 = sphi %s557_s19, %s14_s19   ;;  %s517_s18 = sphi %s555_s18, %s639_s18   ;;  %s513_s17 = sphi %s553_s17, %s638_s17   ;;  %s509_s16 = sphi %s551_s16, %s637_s16   ;;  %s505_s15 = sphi %s549_s15, %s636_s15  }
   0x4   : > { %p24_p0 = scmp.ge.s32.totalorder %s23_s20, 2  ;;  %p420_p1 = scmp.ge.s32.totalorder %s521_s19, 1 }
   0x5   : > { %p206_p2 = scmp.lt.s32.totalorder %s521_s19, 5 }
   0x6   : > { %s641_s20 = smov (%p24_p0, %s23_s20), 0  ;;  %s643_s21 = smov (!%p24_p0, %s26_s21), %s517_s18 }
   0x7   : > { %p207_p3 = pnand %p420_p1, %p206_p2  ;;  %p28_p4 = scmp.ge.s32.totalorder %s643_s21, 2 }
   0x8   : > { %p246_p5 = scmp.lt.s32.totalorder (!%p207_p3), %s509_s16, 1  ;;  %p248_p6 = scmp.lt.s32.totalorder (!%p207_p3), %s505_s15, 2 }
   0x9   : > { %s645_s21 = smov (%p28_p4, %s643_s21), 0  ;;  %210 = sbr.rel (%p207_p3) target bundleno = 218 (0xda), region = 36 }
   0xa   : > { %p427_p7 = scmp.ne.s32.totalorder (!%p207_p3), %s505_s15, 0 }
  0x10   : > { %s647_s16 = smov (!%p246_p5, %s509_s16), 1  ;;  %v523_v5 = vmov (!%p427_p7), 0.0  }
  0x11   : > { %s249_s22 = scalar_select %p248_p6, %s505_s15, 2 }
  0x12   : > { %s433_s23 = smul.u32 3, %s647_s16  ;;  %s583_s24 = sshll.u32 %s647_s16, 3  ;;  %279 = vst [vmem:[#allocation2] sm:$0xff] (!%p427_p7), %v523_v5 }
  0x13   : > { %s257_s27 = scalar_lea.vmem %s632_s1, %s583_s24  ;;  %s261_s30 = scalar_lea.vmem %s633_s2, %s583_s24 }
  0x14   : > { %s251_s5 = sadd.s32 %s433_s23, %s249_s22  ;;  %s265_s8 = scalar_lea.vmem %s634_s3, %s583_s24 }
  0x15   : > { %s421_s9 = sshll.u32 %s251_s5, 3  ;;  %s269_s12 = scalar_lea.vmem %s635_s4, %s583_s24 }
  0x16   : > { %s253_s16 = scalar_lea.vmem %s631_s0, %s421_s9 }
  0x17   : > { %v270_v0 = vld [vmem:[%s253_s16] sm:$0xff] }
  0x18   : > { %v271_v1 = vmul.f32 30.0, %v270_v0 }
  0x1a   : > { %v426_v2 = vadd.f32 -30.0, %v271_v1 }
  0x1c   : > { %v273_v3 = vmul.f32 1.442695, %v426_v2 }
  0x1e   : > { %475 = vpow2.f32 %v273_v3 }
  0x22   : > { %278 = sbr.rel (%p427_p7) target bundleno = 41 (0x29), region = 40 }
  0x28   : > { %v476_v4 = vpop.eup %475 }
  0x29 PF: > { %v280_v6 = vld [vmem:[#allocation2] sm:$0xff]  ;;  %p428_p8 = scmp.ne.s32.totalorder %s505_s15, 1 }
  0x2a   : > { %v281_v7 = vadd.f32 %v476_v4, %v280_v6  ;;  %v287_v9 = vld [vmem:[%s257_s27] sm:$0xff] (!%p428_p8)  ;;  %vm308_vm0 = vcmask (!%p428_p8), 7168  }
  0x2b   : > { %286 = sbr.rel (%p428_p8) target bundleno = 218 (0xda), region = 44  ;;  %v288_v10 = vld [vmem:[%s261_s30] sm:$0xff] (!%p428_p8)  ;;  %v289_v11 = vmul.f32 (!%p428_p8), 30.0, %v287_v9 }
  0x2c   : > { %282 = vst [vmem:[#allocation2] sm:$0xff] %v281_v7  ;;  %v293_v12 = vmul.f32 (!%p428_p8), 30.0, %v288_v10  ;;  %v300_v17 = vld [vmem:[%s265_s8] sm:$0xff] (!%p428_p8) }
  0x2d   : > { %v429_v13 = vadd.f32 (!%p428_p8), -30.0, %v289_v11 }
  0x2e   : > { %v430_v14 = vadd.f32 (!%p428_p8), -30.0, %v293_v12 }
  0x2f   : > { %v291_v15 = vmul.f32 (!%p428_p8), 1.442695, %v429_v13 }
  0x30   : > { %v295_v16 = vmul.f32 (!%p428_p8), 1.442695, %v430_v14 }
  0x31   : > { %477 = vpow2.f32 (!%p428_p8), %v291_v15 }
  0x32   : > { %479 = vpow2.f32 %v295_v16 }
  0x33   : > { %v297_v8 = vld [vmem:[#allocation2] sm:$0xff] }
  0x34   : > { %298 = vadd.xlane.f32.xlu0 %v297_v8 }
  0x3b   : > { %v478_v18 = vpop.eup %477 }
  0x3c   : > { %v480_v21 = vpop.eup %479 }
  0xc1   : > { %v299_v19 = vpop.xlane.xlu0 %298 }
  0xc2   : > { %v301_v20 = vadd.f32 %v300_v17, %v299_v19 }
  0xc4   : > { %v302_v22 = vsub.f32 %v301_v20, %v478_v18 }
  0xc6   : > { %v303_v23 = vadd.f32 %v480_v21, %v302_v22 }
  0xc8   : > { %481 = vlog2.f32 %v303_v23 }
  0xd2   : > { %v482_v24 = vpop.eup %481 }
  0xd3   : > { %v305_v25 = vmul.f32 0.6931472, %v482_v24 }
  0xd5   : > { %v306_v26 = vadd.f32 30.0, %v305_v25 }
  0xd7   : > { %v307_v27 = vsub.f32 %v306_v26, %v293_v12 }
  0xd9   : > { %309 = vst.msk [vmem:[%s269_s12] sm:$0xff] %vm308_vm0, %v307_v27 }
  0xda PF: > { %s14_s19 = sadd.s32 1, %s521_s19   ;;  %s636_s15 = smov %s513_s17 }
  0xdb   : > { %p11_p9 = scmp.ge.s32.totalorder %s14_s19, 6   ;;  %s637_s16 = smov %s517_s18 }
  0xdc   : > { %s638_s17 = smov %s641_s20  ;;  %s639_s18 = smov %s645_s21 }
  0xdd   :  { %13 = sbr.rel (!%p11_p9) target bundleno = 3 (0x3), region = 83 }

</bundles_post_ra>
